<compile_context>
chip_gen: v7x
topology: tpu7x:2x2x1
jax: 0.10.0
libtpu: 0.0.40
codegen_flags: <defaults>
</compile_context>

<pallas_src>
from functools import lru_cache

import numpy as np
import jax
import jax.numpy as jnp
from jax.experimental import pallas as pl
from jax.experimental.pallas import tpu as pltpu

LANE = 128


def _round_up(x, m):
    return ((x + m - 1) // m) * m


def _gcn_stack(z, at, w0, b0, w1, b1, wl, bl):
    """Two GCN layers + final Linear, all in f32 on the MXU/VPU."""
    # gcn_norm: deg over the transposed adjacency, rsqrt, guarded for isolated nodes.
    deg = jnp.sum(at, axis=1, keepdims=True)                      # (N, 1)
    d = jnp.where(deg > 0.0, jax.lax.rsqrt(deg), 0.0)             # (N, 1)

    def agg(x):
        # ahat @ x  with  ahat[i,j] = d[i] * at[i,j] * d[j]  folded as row scalings.
        return d * jnp.dot(at, d * x, preferred_element_type=jnp.float32)

    # GCN layer 0: relu(Ahat @ (z W0) + b0)
    h = jnp.dot(z, w0, preferred_element_type=jnp.float32)
    h = jnp.maximum(agg(h) + b0, 0.0)
    # TODO(synk): Dropout(p=0.5) is identity in eval mode; training-mode RNG mask not implemented.

    # GCN layer 1: relu(Ahat @ (h W1) + b1)
    h = jnp.dot(h, w1, preferred_element_type=jnp.float32)
    h = jnp.maximum(agg(h) + b1, 0.0)

    # final Linear (wl/bl arrive zero-padded to 128 lanes -> lane-dense store).
    return jnp.dot(h, wl, preferred_element_type=jnp.float32) + bl


def decoder_kernel(z_ref, at_ref, w0_ref, b0_ref, w1_ref, b1_ref, wl_ref, bl_ref,
                   out_ref):
    out_ref[...] = _gcn_stack(z_ref[...], at_ref[...],
                              w0_ref[...], b0_ref[...],
                              w1_ref[...], b1_ref[...],
                              wl_ref[...], bl_ref[...])


def decoder_kernel_adj(z_ref, zpad_ref, at_ref, w0_ref, b0_ref, w1_ref, b1_ref,
                       wl_ref, bl_ref, out_ref, adj_ref):
    z = z_ref[...]
    # adj = sigmoid(z @ z.T): contract the feature axis directly (no transpose).
    # zpad is z zero-padded to a 128-multiple of rows so the store is lane-dense;
    # padded columns (sigmoid(0)=0.5) are sliced off in the wrapper.
    logits = jax.lax.dot_general(z, zpad_ref[...],
                                 dimension_numbers=(((1,), (1,)), ((), ())),
                                 preferred_element_type=jnp.float32)
    adj_ref[...] = jax.nn.sigmoid(logits)
    out_ref[...] = _gcn_stack(z, at_ref[...],
                              w0_ref[...], b0_ref[...],
                              w1_ref[...], b1_ref[...],
                              wl_ref[...], bl_ref[...])


@lru_cache(maxsize=None)
def _all_pairs_edge_index(n):
    # dense_to_sparse(sigmoid(z z^T)): sigmoid is strictly positive for finite
    # inputs, so every (i, j) pair survives, in row-major order.  Constant for
    # fixed N -> build once on host.
    # TODO(synk): for sigmoid=False the nonzero count is data dependent (no static-shape equivalent).
    ii = np.repeat(np.arange(n, dtype=np.int32), n)
    jj = np.tile(np.arange(n, dtype=np.int32), n)
    return jnp.asarray(np.stack([ii, jj], axis=0))


def _build_at(edge_index, edge_attr, n):
    """Scatter the COO edge list directly into A'^T (with self-loops of weight 1)."""
    src, dst = edge_index[0], edge_index[1]
    at = jnp.zeros((n, n), jnp.float32).at[dst, src].add(edge_attr.astype(jnp.float32))
    eye = jnp.eye(n, dtype=jnp.float32)
    # PyG add_remaining_self_loops(fill_value=1.): replace diagonal with 1.0.
    return at * (1.0 - eye) + eye


def decoder_forward(z, edge_index, edge_attr, params, return_adj=False):
    """Returns (z_out, new_edge_index[, adj])."""
    N, _ = z.shape
    hidden, Fx = params["wl"].shape
    f_pad = _round_up(Fx, LANE)   # lane-dense z_out width
    n_pad = _round_up(N, LANE)    # lane-dense adj width

    at = _build_at(edge_index, edge_attr, N)

    # Zero-pad final-Linear params so the kernel's output store is 128-lane dense.
    wl_pad = jnp.zeros((hidden, f_pad), jnp.float32).at[:, :Fx].set(params["wl"])
    bl_pad = jnp.zeros((1, f_pad), jnp.float32).at[:, :Fx].set(params["bl"])

    vmem = pl.BlockSpec(memory_space=pltpu.MemorySpace.VMEM)
    # TODO(synk): if many graphs are decoded per step, batch them with grid=(B,)
    # and dimension_semantics=("parallel",) to fill the MXU / shard across cores.

    if return_adj:
        zpad = jnp.zeros((n_pad, z.shape[1]), jnp.float32).at[:N, :].set(z)
        out_pad, adj_pad = pl.pallas_call(
            decoder_kernel_adj,
            out_shape=(jax.ShapeDtypeStruct((N, f_pad), jnp.float32),
                       jax.ShapeDtypeStruct((N, n_pad), jnp.float32)),
            in_specs=[vmem] * 9,
            out_specs=(vmem, vmem),
        )(z, zpad, at, params["w0"], params["b0"], params["w1"], params["b1"],
          wl_pad, bl_pad)
        return out_pad[:, :Fx], _all_pairs_edge_index(N), adj_pad[:, :N]

    # adj is not part of the module's return value -> skip the N^2 matmul/store.
    out_pad = pl.pallas_call(
        decoder_kernel,
        out_shape=jax.ShapeDtypeStruct((N, f_pad), jnp.float32),
        in_specs=[vmem] * 8,
        out_specs=vmem,
    )(z, at, params["w0"], params["b0"], params["w1"], params["b1"],
      wl_pad, bl_pad)
    return out_pad[:, :Fx], _all_pairs_edge_index(N)


def _reference(z, edge_index, edge_attr, params):
    """Pure-JAX reference for correctness checking."""
    N = z.shape[0]
    src, dst = edge_index[0], edge_index[1]
    A = jnp.zeros((N, N), jnp.float32).at[src, dst].add(edge_attr)
    eye = jnp.eye(N, dtype=jnp.float32)
    A = A * (1.0 - eye) + eye
    At = A.T
    adj = jax.nn.sigmoid(z @ z.T)
    deg = At.sum(axis=1, keepdims=True)
    d = jnp.where(deg > 0.0, 1.0 / jnp.sqrt(deg), 0.0)
    ahat = d * At * d.T
    h = jnp.maximum(ahat @ (z @ params["w0"]) + params["b0"], 0.0)
    h = jnp.maximum(ahat @ (h @ params["w1"]) + params["b1"], 0.0)
    out = h @ params["wl"] + params["bl"]
    return out, adj


if __name__ == "__main__":
    # Small shapes consistent with the module: N nodes, z_features -> 2*x_features -> x_features.
    N = 16
    z_features = 32
    x_features = 16
    hidden = 2 * x_features  # 32

    key = jax.random.PRNGKey(0)
    k_z, k_src, k_dst, k_attr, k_w0, k_b0, k_w1, k_b1, k_wl, k_bl = jax.random.split(key, 10)

    z = jax.random.normal(k_z, (N, z_features), dtype=jnp.float32)

    num_edges = 48
    src = jax.random.randint(k_src, (num_edges,), 0, N, dtype=jnp.int32)
    dst = jax.random.randint(k_dst, (num_edges,), 0, N, dtype=jnp.int32)
    edge_index = jnp.stack([src, dst], axis=0)                    # (2, E)
    edge_attr = jax.random.uniform(k_attr, (num_edges,), jnp.float32, 0.5, 1.5)

    # Parameter shapes from __init__:
    #   GCNConv_0: (z_features, 2*x_features)   GCNConv_1: (2*x_features, 2*x_features)
    #   Linear   : (2*x_features, x_features) with bias
    params = {
        "w0": jax.random.normal(k_w0, (z_features, hidden), jnp.float32) * 0.1,
        "b0": jax.random.normal(k_b0, (1, hidden), jnp.float32) * 0.1,
        "w1": jax.random.normal(k_w1, (hidden, hidden), jnp.float32) * 0.1,
        "b1": jax.random.normal(k_b1, (1, hidden), jnp.float32) * 0.1,
        "wl": jax.random.normal(k_wl, (hidden, x_features), jnp.float32) * 0.1,
        "bl": jax.random.normal(k_bl, (1, x_features), jnp.float32) * 0.1,
    }

    # Module-faithful path (adj never materialized).
    z_out, new_edge_index = jax.block_until_ready(
        decoder_forward(z, edge_index, edge_attr, params))

    # Diagnostic path that also returns sigmoid(z z^T), for verification.
    z_out2, _, adj = jax.block_until_ready(
        decoder_forward(z, edge_index, edge_attr, params, return_adj=True))

    ref_out, ref_adj = _reference(z, edge_index, edge_attr, params)
    assert z_out.shape == (N, x_features)
    assert new_edge_index.shape == (2, N * N)
    assert jnp.allclose(z_out, ref_out, rtol=1e-2, atol=1e-2), "z_out mismatch"
    assert jnp.allclose(z_out2, ref_out, rtol=1e-2, atol=1e-2), "z_out (adj path) mismatch"
    assert jnp.allclose(adj, ref_adj, rtol=1e-2, atol=1e-2), "adj mismatch"

    print("KERNEL_OK")
</pallas_src>

<mosaic_0001>
module attributes {stable_mosaic.version = 11 : i64} {
  func.func @decoder_kernel(%arg0: memref<16x32xf32, #tpu.memory_space<vmem>>, %arg1: memref<16x16xf32, #tpu.memory_space<vmem>>, %arg2: memref<32x32xf32, #tpu.memory_space<vmem>>, %arg3: memref<1x32xf32, #tpu.memory_space<vmem>>, %arg4: memref<32x32xf32, #tpu.memory_space<vmem>>, %arg5: memref<1x32xf32, #tpu.memory_space<vmem>>, %arg6: memref<32x128xf32, #tpu.memory_space<vmem>>, %arg7: memref<1x128xf32, #tpu.memory_space<vmem>>, %arg8: memref<16x128xf32, #tpu.memory_space<vmem>>) attributes {dimension_semantics = [], scalar_prefetch = 0 : i64, scratch_operands = 0 : i64, tpu.core_type = #tpu.core_type<tc>} {
    %c0 = arith.constant 0 : index
    %c0_0 = arith.constant 0 : index
    %0 = vector.load %arg0[%c0, %c0_0] : memref<16x32xf32, #tpu.memory_space<vmem>>, vector<16x32xf32>
    %c0_1 = arith.constant 0 : index
    %c0_2 = arith.constant 0 : index
    %1 = vector.load %arg1[%c0_1, %c0_2] : memref<16x16xf32, #tpu.memory_space<vmem>>, vector<16x16xf32>
    %c0_3 = arith.constant 0 : index
    %c0_4 = arith.constant 0 : index
    %2 = vector.load %arg2[%c0_3, %c0_4] : memref<32x32xf32, #tpu.memory_space<vmem>>, vector<32x32xf32>
    %c0_5 = arith.constant 0 : index
    %c0_6 = arith.constant 0 : index
    %3 = vector.load %arg3[%c0_5, %c0_6] : memref<1x32xf32, #tpu.memory_space<vmem>>, vector<1x32xf32>
    %c0_7 = arith.constant 0 : index
    %c0_8 = arith.constant 0 : index
    %4 = vector.load %arg4[%c0_7, %c0_8] : memref<32x32xf32, #tpu.memory_space<vmem>>, vector<32x32xf32>
    %c0_9 = arith.constant 0 : index
    %c0_10 = arith.constant 0 : index
    %5 = vector.load %arg5[%c0_9, %c0_10] : memref<1x32xf32, #tpu.memory_space<vmem>>, vector<1x32xf32>
    %c0_11 = arith.constant 0 : index
    %c0_12 = arith.constant 0 : index
    %6 = vector.load %arg6[%c0_11, %c0_12] : memref<32x128xf32, #tpu.memory_space<vmem>>, vector<32x128xf32>
    %c0_13 = arith.constant 0 : index
    %c0_14 = arith.constant 0 : index
    %7 = vector.load %arg7[%c0_13, %c0_14] : memref<1x128xf32, #tpu.memory_space<vmem>>, vector<1x128xf32>
    %cst = arith.constant dense<0.000000e+00> : vector<16xf32>
    %8 = vector.multi_reduction <add>, %1, %cst [1] : vector<16x16xf32> to vector<16xf32>
    %9 = vector.shape_cast %8 : vector<16xf32> to vector<16x1xf32>
    %cst_15 = arith.constant 0.000000e+00 : f32
    %10 = vector.broadcast %cst_15 : f32 to vector<16x1xf32>
    %11 = arith.cmpf ogt, %9, %10 : vector<16x1xf32>
    %12 = math.rsqrt %9 : vector<16x1xf32>
    %cst_16 = arith.constant 0.000000e+00 : f32
    %13 = vector.broadcast %cst_16 : f32 to vector<16x1xf32>
    %14 = arith.select %11, %12, %13 : vector<16x1xi1>, vector<16x1xf32>
    %cst_17 = arith.constant dense<0.000000e+00> : vector<16x32xf32>
    %15 = tpu.matmul %0, %2, %cst_17 {dimension_numbers = #tpu.dot_dimension_numbers<[1], [0], [0], [1], [0, 0, 1, 1], [], []>} : vector<16x32xf32>, vector<32x32xf32>, vector<16x32xf32> -> vector<16x32xf32>
    %16 = vector.broadcast %14 : vector<16x1xf32> to vector<16x32xf32>
    %17 = arith.mulf %16, %15 : vector<16x32xf32>
    %cst_18 = arith.constant dense<0.000000e+00> : vector<16x32xf32>
    %18 = tpu.matmul %1, %17, %cst_18 {dimension_numbers = #tpu.dot_dimension_numbers<[1], [0], [0], [1], [0, 0, 1, 1], [], []>} : vector<16x16xf32>, vector<16x32xf32>, vector<16x32xf32> -> vector<16x32xf32>
    %19 = vector.broadcast %14 : vector<16x1xf32> to vector<16x32xf32>
    %20 = arith.mulf %19, %18 : vector<16x32xf32>
    %21 = vector.broadcast %3 : vector<1x32xf32> to vector<16x32xf32>
    %22 = arith.addf %20, %21 : vector<16x32xf32>
    %cst_19 = arith.constant 0.000000e+00 : f32
    %23 = vector.broadcast %cst_19 : f32 to vector<16x32xf32>
    %24 = arith.maximumf %22, %23 : vector<16x32xf32>
    %cst_20 = arith.constant dense<0.000000e+00> : vector<16x32xf32>
    %25 = tpu.matmul %24, %4, %cst_20 {dimension_numbers = #tpu.dot_dimension_numbers<[1], [0], [0], [1], [0, 0, 1, 1], [], []>} : vector<16x32xf32>, vector<32x32xf32>, vector<16x32xf32> -> vector<16x32xf32>
    %26 = vector.broadcast %14 : vector<16x1xf32> to vector<16x32xf32>
    %27 = arith.mulf %26, %25 : vector<16x32xf32>
    %cst_21 = arith.constant dense<0.000000e+00> : vector<16x32xf32>
    %28 = tpu.matmul %1, %27, %cst_21 {dimension_numbers = #tpu.dot_dimension_numbers<[1], [0], [0], [1], [0, 0, 1, 1], [], []>} : vector<16x16xf32>, vector<16x32xf32>, vector<16x32xf32> -> vector<16x32xf32>
    %29 = vector.broadcast %14 : vector<16x1xf32> to vector<16x32xf32>
    %30 = arith.mulf %29, %28 : vector<16x32xf32>
    %31 = vector.broadcast %5 : vector<1x32xf32> to vector<16x32xf32>
    %32 = arith.addf %30, %31 : vector<16x32xf32>
    %cst_22 = arith.constant 0.000000e+00 : f32
    %33 = vector.broadcast %cst_22 : f32 to vector<16x32xf32>
    %34 = arith.maximumf %32, %33 : vector<16x32xf32>
    %cst_23 = arith.constant dense<0.000000e+00> : vector<16x128xf32>
    %35 = tpu.matmul %34, %6, %cst_23 {dimension_numbers = #tpu.dot_dimension_numbers<[1], [0], [0], [1], [0, 0, 1, 1], [], []>} : vector<16x32xf32>, vector<32x128xf32>, vector<16x128xf32> -> vector<16x128xf32>
    %36 = vector.broadcast %7 : vector<1x128xf32> to vector<16x128xf32>
    %37 = arith.addf %35, %36 : vector<16x128xf32>
    %c0_24 = arith.constant 0 : index
    %c0_25 = arith.constant 0 : index
    %38 = vector.load %arg8[%c0_24, %c0_25] : memref<16x128xf32, #tpu.memory_space<vmem>>, vector<16x128xf32>
    tpu.vector_store %arg8[%c0_24, %c0_25], %37 {strides = array<i32>} : memref<16x128xf32, #tpu.memory_space<vmem>>, vector<16x128xf32>,
    return
  }
}

</mosaic_0001>

<bundles_post_ra>
// kernel: tpu_custom_call.1
= control target key start
LH: loop header
LB: loop body
LE: loop exit
PB: predicated region body
PF: predicated region fallthrough
CT: control target
= control target key end

     0   :  { %13 = vsyncpa [#allocation3], 0  ;;  %s1033_s0 = inlined_call_operand.hbm [shape: f32[16,32], index: 0, kind: input, shape index: {}]   ;;  %s1034_s1 = inlined_call_operand.hbm [shape: f32[16,16], index: 1, kind: input, shape index: {}]   ;;  %s1035_s2 = inlined_call_operand.hbm [shape: f32[32,32], index: 2, kind: input, shape index: {}]   ;;  %s1036_s3 = inlined_call_operand.vmem [shape: f32[1,32], index: 3, kind: input, shape index: {}]   ;;  %s1037_s4 = inlined_call_operand.hbm [shape: f32[32,32], index: 4, kind: input, shape index: {}]   ;;  %s1038_s5 = inlined_call_operand.vmem [shape: f32[1,32], index: 5, kind: input, shape index: {}]   ;;  %s1039_s6 = inlined_call_operand.hbm [shape: f32[32,128], index: 6, kind: input, shape index: {}]   ;;  %s1040_s7 = inlined_call_operand.vmem [shape: f32[1,128], index: 7, kind: input, shape index: {}]   ;;  %s1041_s8 = inlined_call_operand.hbm [shape: f32[16,128], index: 8, kind: output, shape index: {}]  }
   0x1   :  { %14 = vsyncpa [#allocation6], 0 }
   0x2   :  { %15 = vsyncpa [#allocation9], 0 }
   0x3   :  { %16 = vsyncpa [#allocation4], 0  ;;  %s855_s27 = smov [#allocation5]   ;;  %s856_s29 = smov [#allocation8]  }
   0x4   :  { %s34_s28 = sshll.u32 %s855_s27, 4  ;;  %s60_s30 = sshll.u32 %s856_s29, 4  ;;  %s35_s28 = int_to_ptr.vmem [resolvable:$true] %s34_s28  ;;  %s908_s30 = int_to_ptr.vmem [resolvable:$true] %s60_s30 }
   0x5   :  { %s715_s11 = scalar_lea.hbm %s1034_s1, 256 }
   0x6   :  { %p716_p0 = scmp.ne.s32.totalorder %s1034_s1, %s715_s11  ;;  %p719_p1 = scmp.lt.u32.totalorder %s715_s11, %s1034_s1 }
   0x8   :  { %p721_p2 = pnand %p719_p1, %p716_p0 }
   0xa   :  { %724 = shalt.err (!%p721_p2)
}
   0xb   :  { %s725_s16 = scalar_lea.vmem %s35_s28, 256  ;;  %p730_p4 = scmp.lt.s32.totalorder %s35_s28, %s35_s28 }
   0xc   :  { %p726_p3 = scmp.ne.s32.totalorder %s35_s28, %s725_s16  ;;  %p731_p5 = scmp.lt.s32.totalorder %s725_s16, %s725_s16 }
   0xe   :  { %p732_p6 = por %p731_p5, %p730_p4 }
  0x10   :  { %p733_p7 = pnand %p732_p6, %p726_p3 }
  0x12   :  { %736 = shalt.err (!%p733_p7)
}
  0x13   :  { %s857_s17 = smov 128   ;;  %s858_s18 = smov 8  }
  0x14   :  { %40 = dma.hbm_to_vmem [thread:$0]  %s1034_s1, 256, %s35_s28, [#allocation6], %s857_s17, %s857_s17, %s858_s18  }
  0x15   :  { %s737_s23 = scalar_lea.hbm %s1037_s4, 512 }
  0x16   :  { %p738_p8 = scmp.ne.s32.totalorder %s1037_s4, %s737_s23  ;;  %p741_p9 = scmp.lt.u32.totalorder %s737_s23, %s1037_s4 }
  0x18   :  { %p743_p10 = pnand %p741_p9, %p738_p8 }
  0x1a   :  { %746 = shalt.err (!%p743_p10)
}
  0x1b   :  { %s747_s29 = scalar_lea.vmem %s908_s30, 512  ;;  %p752_p12 = scmp.lt.s32.totalorder %s908_s30, %s908_s30 }
  0x1c   :  { %p748_p11 = scmp.ne.s32.totalorder %s908_s30, %s747_s29  ;;  %p753_p13 = scmp.lt.s32.totalorder %s747_s29, %s747_s29 }
  0x1e   :  { %p754_p0 = por %p753_p13, %p752_p12 }
  0x20   :  { %p755_p1 = pnand %p754_p0, %p748_p11 }
  0x22   :  { %758 = shalt.err (!%p755_p1)
}
  0x23   :  { %66 = dma.hbm_to_vmem [thread:$0]  %s1037_s4, 512, %s908_s30, [#allocation9], %s857_s17, %s857_s17, %s858_s18  }
  0x24   :  { %s859_s9 = smov [#allocation2]   ;;  %s860_s11 = smov [#allocation7]  }
  0x25   :  { %s22_s10 = sshll.u32 %s859_s9, 4  ;;  %s46_s12 = sshll.u32 %s860_s11, 4  ;;  %s23_s10 = int_to_ptr.vmem [resolvable:$true] %s22_s10  ;;  %s945_s12 = int_to_ptr.vmem [resolvable:$true] %s46_s12 }
  0x26   :  { %s759_s15 = scalar_lea.hbm %s1033_s0, 256 }
  0x27   :  { %p760_p2 = scmp.ne.s32.totalorder %s1033_s0, %s759_s15  ;;  %p763_p3 = scmp.lt.u32.totalorder %s759_s15, %s1033_s0 }
  0x29   :  { %p765_p4 = pnand %p763_p3, %p760_p2 }
  0x2b   :  { %768 = shalt.err (!%p765_p4)
}
  0x2c   :  { %s769_s4 = scalar_lea.vmem %s23_s10, 256  ;;  %p774_p6 = scmp.lt.s32.totalorder %s23_s10, %s23_s10 }
  0x2d   :  { %p770_p5 = scmp.ne.s32.totalorder %s23_s10, %s769_s4  ;;  %p775_p7 = scmp.lt.s32.totalorder %s769_s4, %s769_s4 }
  0x2f   :  { %p776_p8 = por %p775_p7, %p774_p6 }
  0x31   :  { %p777_p9 = pnand %p776_p8, %p770_p5 }
  0x33   :  { %780 = shalt.err (!%p777_p9)
}
  0x34   :  { %28 = dma.hbm_to_vmem [thread:$0]  %s1033_s0, 256, %s23_s10, [#allocation3], %s857_s17, %s857_s17, %s858_s18  }
  0x35   :  { %s781_s25 = scalar_lea.hbm %s1035_s2, 512 }
  0x36   :  { %p782_p10 = scmp.ne.s32.totalorder %s1035_s2, %s781_s25  ;;  %p785_p11 = scmp.lt.u32.totalorder %s781_s25, %s1035_s2 }
  0x38   :  { %p787_p12 = pnand %p785_p11, %p782_p10 }
  0x3a   :  { %790 = shalt.err (!%p787_p12)
}
  0x3b   :  { %s791_s28 = scalar_lea.vmem %s945_s12, 512  ;;  %p796_p0 = scmp.lt.s32.totalorder %s945_s12, %s945_s12 }
  0x3c   :  { %p792_p13 = scmp.ne.s32.totalorder %s945_s12, %s791_s28  ;;  %p797_p1 = scmp.lt.s32.totalorder %s791_s28, %s791_s28 }
  0x3e   :  { %p798_p2 = por %p797_p1, %p796_p0 }
  0x40   :  { %p799_p3 = pnand %p798_p2, %p792_p13 }
  0x42   :  { %802 = shalt.err (!%p799_p3)
}
  0x43   :  { %52 = dma.hbm_to_vmem [thread:$0]  %s1035_s2, 512, %s945_s12, [#allocation6], %s857_s17, %s857_s17, %s858_s18  }
  0x44   :  { %s861_s10 = smov [#allocation10]   ;;  %s803_s15 = scalar_lea.hbm %s1039_s6, 512 }
  0x45   :  { %s74_s11 = sshll.u32 %s861_s10, 4  ;;  %p804_p4 = scmp.ne.s32.totalorder %s1039_s6, %s803_s15  ;;  %s75_s11 = int_to_ptr.vmem [resolvable:$true] %s74_s11 }
  0x46   :  { %p807_p5 = scmp.lt.u32.totalorder %s803_s15, %s1039_s6 }
  0x48   :  { %p809_p6 = pnand %p807_p5, %p804_p4 }
  0x4a   :  { %812 = shalt.err (!%p809_p6)
}
  0x4b   :  { %s813_s4 = scalar_lea.vmem %s75_s11, 512  ;;  %p818_p8 = scmp.lt.s32.totalorder %s75_s11, %s75_s11 }
  0x4c   :  { %p814_p7 = scmp.ne.s32.totalorder %s75_s11, %s813_s4  ;;  %p819_p9 = scmp.lt.s32.totalorder %s813_s4, %s813_s4 }
  0x4e   :  { %p820_p10 = por %p819_p9, %p818_p8 }
  0x50   :  { %p821_p11 = pnand %p820_p10, %p814_p7 }
  0x52   :  { %824 = shalt.err (!%p821_p11)
}
  0x53   :  { %80 = dma.hbm_to_vmem [thread:$0]  %s1039_s6, 512, %s75_s11, [#allocation9], %s857_s17, %s857_s17, %s858_s18  }
  0x54   :  { %847 = dma.done.wait [#allocation3], 256  }
  0x55   :  { %848 = vsyncadd [#allocation3], 4294967040 }
  0x56   :  { %849 = dma.done.wait [#allocation6], 768  }
  0x57   :  { %850 = vsyncadd [#allocation6], 4294966528 }
  0x58   :  { %851 = dma.done.wait [#allocation9], 1024  }
  0x59   :  { %852 = vsyncadd [#allocation9], 4294966272  ;;  %vm130_vm0 = vcmask 261120   ;;  %v102_v0 = vld [vmem:[#allocation7] sm:$0xff]  ;;  %v103_v1 = vld [vmem:[#allocation7 + $0x8] sm:$0xff]  ;;  %vm117_vm1 = vcmask 130048  }
  0x5a   :  { %v104_v2 = vld [vmem:[#allocation7 + $0x10] sm:$0xff]  ;;  %v671_v3 = vpack.c.bf16 %v103_v1, %v102_v0  ;;  %v105_v4 = vld [vmem:[#allocation7 + $0x18] sm:$0xff]  ;;  %v98_v5 = vld [vmem:[#allocation2] sm:$0xff]  ;;  %s862_s25 = smov [#allocation11]  }
  0x5b   :  { %v675_v6 = vpack.c.bf16 %v105_v4, %v104_v2  ;;  %632 = vmatprep.mubr.msk.f32.mxu0 %vm130_vm0, %v98_v5  ;;  %v100_v7 = vld [vmem:[#allocation5] sm:$0xff]  ;;  %v101_v8 = vld [vmem:[#allocation5 + $0x8] sm:$0xff]  ;;  %v99_v11 = vld [vmem:[#allocation2 + $0x8] sm:$0xff]  ;;  %s571_s26 = sshll.u32 %s862_s25, 4  ;;  %s572_s26 = int_to_ptr.vmem [resolvable:$true] %s571_s26 }
  0x5c   :  { %672 = vmatprep.subr.bf16.mxu0 %v671_v3  ;;  %v118_v9 = vsel %vm117_vm1, %v100_v7, 0.0  ;;  %639 = vmatprep.mubr.msk.f32.mxu1 %vm117_vm1, %v100_v7  ;;  %v121_v10 = vsel %vm117_vm1, %v101_v8, 0.0  ;;  %v107_v23 = vld [vmem:[#allocation8] sm:$0xff]  ;;  %v108_v24 = vld [vmem:[#allocation8 + $0x8] sm:$0xff]  ;;  %v109_v26 = vld [vmem:[#allocation8 + $0x10] sm:$0xff]  ;;  %p830_p13 = scmp.lt.s32.totalorder %s572_s26, %s572_s26 }
  0x5d   :  { %674 = vmatpush3.bf16.msra.mxu0 %v671_v3  ;;  %119 = vadd.xlane.f32.xlu0 %v118_v9  ;;  %v683_v25 = vpack.c.bf16 %v108_v24, %v107_v23  ;;  %v110_v27 = vld [vmem:[#allocation8 + $0x18] sm:$0xff]  ;;  %v589_v29 = vld [vmem:[%s1036_s3] ss:$0 sm:$0xff]  ;;  %v113_v44 = vld [vmem:[#allocation10 + $0x8] sm:$0xff] }
  0x5e   :  { %676 = vmatprep.subr.bf16.mxu0 %v675_v6  ;;  %v687_v28 = vpack.c.bf16 %v110_v27, %v109_v26  ;;  %v112_v43 = vld [vmem:[#allocation10] sm:$0xff]  ;;  %v114_v46 = vld [vmem:[#allocation10 + $0x10] sm:$0xff]  ;;  %v115_v47 = vld [vmem:[#allocation10 + $0x18] sm:$0xff] }
  0x5f   :  { %v695_v45 = vpack.c.bf16 %v113_v44, %v112_v43  ;;  %v699_v48 = vpack.c.bf16 %v115_v47, %v114_v46  ;;  %v594_v49 = vld [vmem:[%s1038_s5] ss:$0 sm:$0xff]  ;;  %s825_s5 = scalar_lea.vmem %s572_s26, 256 }
  0x60   :  { %v595_v58 = vld [vmem:[%s1040_s7] ss:$0 sm:$0xff]  ;;  %p826_p12 = scmp.ne.s32.totalorder %s572_s26, %s825_s5  ;;  %p831_p0 = scmp.lt.s32.totalorder %s825_s5, %s825_s5 }
  0x61   :  { %678 = vmatpush3.bf16.msra.mxu0 %v675_v6  ;;  %122 = vadd.xlane.f32.xlu0 %v121_v10 }
  0x62   :  { %696 = vmatprep.subr.bf16.mxu0 %v695_v45  ;;  %p832_p1 = por %p831_p0, %p830_p13 }
  0x64   :  { %633 = vmatmul.mubr.msk.f32.vlgmr.msra.gmra.mrb[0].mxu0 %vm130_vm0, %v99_v11  ;;  %p833_p2 = pnand %p832_p1, %p826_p12 }
  0x65   :  { %698 = vmatpush3.bf16.msra.mxu0 %v695_v45 }
  0x66   :  { %700 = vmatprep.subr.bf16.mxu0 %v699_v48 }
  0x69   :  { %702 = vmatpush3.bf16.msra.mxu0 %v699_v48 }
  0xea   :  { %v120_v12 = vpop.xlane.xlu0 %119 }
  0xeb   :  { %vm124_vm3 = vcmp.gt.f32.partialorder %v120_v12, 0.0 }
  0xee   :  { %v123_v13 = vpop.xlane.xlu0 %122 }
  0xef   :  { %711 = vrsqrt.f32 %v123_v13  ;;  %vm125_vm2 = vcmp.gt.f32.partialorder %v123_v13, 0.0 }
  0xf0   :  { %713 = vrsqrt.f32 %v120_v12 }
  0xf9   :  { %v712_v14 = vpop.eup %711 }
  0xfa   :  { %v714_v15 = vpop.eup %713  ;;  %v129_v16 = vsel %vm125_vm2, %v712_v14, 0.0 }
  0xfb   :  { %v128_v18 = vsel %vm124_vm3, %v714_v15, 0.0 }
 0x137   :  { %v634_v17 = vpop.f32.mrb[0].mxu0 }
 0x138   :  { %v213_v19 = vmul.f32 %v634_v17, %v129_v16  ;;  %v203_v20 = vpop.f32.mrb[1].mxu0 }
 0x139   :  { %v212_v21 = vmul.f32 %v203_v20, %v128_v18 }
 0x13b   :  { %v679_v22 = vpack.c.bf16 %v213_v19, %v212_v21 }
 0x13d   :  { %680 = vmatprep.subr.bf16.mxu1 %v679_v22 }
 0x13e   :  { %682 = vmatpush3.bf16.msra.mxu1 %v679_v22 }
 0x13f   :  { %684 = vmatprep.subr.bf16.mxu1 %v683_v25 }
 0x141   :  { %640 = vmatmul.mubr.msk.f32.vlgmr.msra.gmra.mrb[0].mxu1 %vm117_vm1, %v101_v8 }
 0x142   :  { %686 = vmatpush3.bf16.msra.mxu1 %v683_v25 }
 0x143   :  { %688 = vmatprep.subr.bf16.mxu1 %v687_v28 }
 0x146   :  { %690 = vmatpush3.bf16.msra.mxu1 %v687_v28 }
 0x214   :  { %v641_v30 = vpop.f32.mrb[0].mxu1 }
 0x215   :  { %v296_v31 = vmul.f32 %v641_v30, %v129_v16  ;;  %v286_v32 = vpop.f32.mrb[1].mxu1 }
 0x216   :  { %v295_v33 = vmul.f32 %v286_v32, %v128_v18 }
 0x217   :  { %v304_v34 = vadd.f32 %v589_v29, %v296_v31 }
 0x218   :  { %v303_v35 = vadd.f32 %v589_v29, %v295_v33 }
 0x219   :  { %v306_v37 = vmax.f32 %v304_v34, 0.0 }
 0x21a   :  { %v305_v36 = vmax.f32 %v303_v35, 0.0 }
 0x21c   :  { %650 = vmatprep.mubr.msk.f32.mxu1 %vm130_vm0, %v305_v36 }
 0x21d   :  { %651 = vmatmul.mubr.msk.f32.vlgmr.msra.gmra.mrb[2].mxu1 %vm130_vm0, %v306_v37 }
 0x21e   :  { %657 = vmatprep.mubr.msk.f32.mxu1 %vm117_vm1, %v100_v7 }
 0x2f0   :  { %v652_v38 = vpop.f32.mrb[2].mxu1 }
 0x2f1   :  { %v389_v39 = vmul.f32 %v652_v38, %v129_v16  ;;  %v379_v40 = vpop.f32.mrb[3].mxu1 }
 0x2f2   :  { %v388_v41 = vmul.f32 %v379_v40, %v128_v18 }
 0x2f4   :  { %v691_v42 = vpack.c.bf16 %v389_v39, %v388_v41 }
 0x2f6   :  { %692 = vmatprep.subr.bf16.mxu1 %v691_v42 }
 0x2f7   :  { %694 = vmatpush3.bf16.msra.mxu1 %v691_v42 }
 0x2fa   :  { %658 = vmatmul.mubr.msk.f32.vlgmr.msra.gmra.mrb[4].mxu1 %vm117_vm1, %v101_v8 }
 0x3cd   :  { %v659_v50 = vpop.f32.mrb[4].mxu1 }
 0x3ce   :  { %v466_v51 = vmul.f32 %v659_v50, %v129_v16  ;;  %v456_v52 = vpop.f32.mrb[5].mxu1 }
 0x3cf   :  { %v465_v53 = vmul.f32 %v456_v52, %v128_v18 }
 0x3d0   :  { %v474_v54 = vadd.f32 %v594_v49, %v466_v51 }
 0x3d1   :  { %v473_v55 = vadd.f32 %v594_v49, %v465_v53 }
 0x3d2   :  { %v476_v57 = vmax.f32 %v474_v54, 0.0 }
 0x3d3   :  { %v475_v56 = vmax.f32 %v473_v55, 0.0 }
 0x3d5   :  { %668 = vmatprep.mubr.msk.f32.mxu0 %vm130_vm0, %v475_v56 }
 0x3d6   :  { %669 = vmatmul.mubr.msk.f32.vlgmr.msra.gmra.mrb[2].mxu0 %vm130_vm0, %v476_v57 }
 0x4a9   :  { %v670_v59 = vpop.f32.mrb[2].mxu0 }
 0x4aa   :  { %v561_v60 = vadd.f32 %v670_v59, %v595_v58  ;;  %v555_v61 = vpop.f32.mrb[3].mxu0 }
 0x4ab   :  { %v556_v62 = vadd.f32 %v595_v58, %v555_v61 }
 0x4ac   :  { %565 = vst [vmem:[#allocation11 + $0x8] sm:$0xff] %v561_v60 }
 0x4ad   :  { %564 = vst [vmem:[#allocation11] sm:$0xff] %v556_v62 }
 0x4ae   :  { %836 = shalt.err (!%p833_p2)
}
 0x4af   :  { %s837_s7 = scalar_lea.hbm %s1041_s8, 256 }
 0x4b0   :  { %p838_p3 = scmp.ne.s32.totalorder %s1041_s8, %s837_s7  ;;  %p841_p4 = scmp.lt.u32.totalorder %s837_s7, %s1041_s8 }
 0x4b2   :  { %p843_p5 = pnand %p841_p4, %p838_p3 }
 0x4b4   :  { %846 = shalt.err (!%p843_p5)
}
 0x4b5   :  { %577 = dma.vmem_to_hbm [thread:$0]  %s572_s26, 256, %s1041_s8, [#allocation4], %s857_s17, %s857_s17, %s858_s18  }
 0x4b6   :  { %853 = dma.done.wait [#allocation4], 256  }
 0x4b7   :  { %854 = vsyncadd [#allocation4], 4294967040 }
 0x4b8   :  { %581 = vsyncpa [#allocation3], 1 }
 0x4b9   :  { %582 = vsyncpa [#allocation6], 1 }
 0x4ba   :  { %583 = vsyncpa [#allocation9], 1 }
 0x4bb   :  { %584 = vsyncpa [#allocation4], 1 }

</bundles_post_ra>
